<compile_context>
chip_gen: v7x
topology: tpu7x:2x2x1
jax: 0.10.0
libtpu: 0.0.40
codegen_flags: <defaults>
</compile_context>

<pallas_src>
import functools

import jax
import jax.numpy as jnp
from jax import lax
from jax.experimental import pallas as pl
from jax.experimental.pallas import tpu as pltpu

_MIB = 1 << 20


def _round_up(x, m):
    return ((x + m - 1) // m) * m


def _tpu_plan():
    """Per-generation (vmem_work_budget_bytes, vmem_limit_bytes_or_None, num_cores)."""
    kind = ""
    try:
        kind = jax.devices()[0].device_kind.lower()
    except Exception:  # pragma: no cover - defensive
        pass
    if "v7" in kind:
        # v7x: 64 MiB physical VMEM per TensorCore, 2 TensorCores per chip.
        return 32 * _MIB, 48 * _MIB, 2
    if ("v6" in kind) or ("v5" in kind) or ("v4" in kind):
        # v5e / v6e / v4 / v5p: 128 MiB physical VMEM.
        cores = 2 if ("v4" in kind or "v5p" in kind) else 1
        return 64 * _MIB, 96 * _MIB, cores
    # Unknown / older chips: stay inside the default scoped-VMEM limit.
    return 10 * _MIB, None, 1


def _ce_kernel(x_ref, t_ref, sum_out_ref, cnt_out_ref, sum_acc, cnt_acc, *,
               ignore_index, hw, tile, p_per_core, needs_bounds_mask):
    c = pl.program_id(0)   # TensorCore shard of the pixel range
    n = pl.program_id(1)   # batch
    p = pl.program_id(2)   # pixel block within this core's shard

    # Per-core accumulator init: first step of THIS core's sub-grid.
    @pl.when(jnp.logical_and(n == 0, p == 0))
    def _():
        sum_acc[...] = jnp.zeros_like(sum_acc)
        cnt_acc[...] = jnp.zeros_like(cnt_acc)

    logits = x_ref[0].astype(jnp.float32)   # (C, T): classes on sublanes, pixels on lanes
    tgt = t_ref[0]                          # (1, T) int32
    C, T = logits.shape

    # Numerically stable log-sum-exp over the channel (sublane) axis; `shifted`
    # is reused for both the exp-sum and the picked-class term so the raw logits
    # tile does not stay live past the subtract.
    m = jnp.max(logits, axis=0, keepdims=True)                        # (1, T)
    shifted = logits - m                                              # (C, T)
    sum_exp = jnp.sum(jnp.exp(shifted), axis=0, keepdims=True)        # (1, T)

    ch = lax.broadcasted_iota(jnp.int32, (C, T), 0)
    picked_shifted = jnp.sum(jnp.where(ch == tgt, shifted, 0.0),
                             axis=0, keepdims=True)                   # (1, T)
    nll = jnp.log(sum_exp) - picked_shifted                           # (1, T)

    # Validity mask: not ignore_index, and (only when needed at compile time)
    # inside the true H*W extent — this also neutralizes phantom blocks whose
    # global block index was clamped in the index_map.
    valid = tgt != ignore_index
    if needs_bounds_mask:
        g = c * p_per_core + p                                        # unclamped
        col = lax.broadcasted_iota(jnp.int32, (1, T), 1)
        valid = jnp.logical_and(valid, (g * tile + col) < hw)

    # Per-lane vector accumulation (select-based masking: stale/garbage lanes,
    # even NaN/Inf ones, never enter the accumulators).
    sum_acc[...] += jnp.where(valid, nll, 0.0)
    cnt_acc[...] += valid.astype(jnp.float32)

    # Finalize: cross-lane reduce this core's partials once, on its last step.
    @pl.when(jnp.logical_and(n == pl.num_programs(1) - 1,
                             p == pl.num_programs(2) - 1))
    def _():
        s_tot = jnp.sum(sum_acc[...])
        c_tot = jnp.sum(cnt_acc[...])
        sum_out_ref[...] = jnp.broadcast_to(s_tot, sum_out_ref.shape)
        cnt_out_ref[...] = jnp.broadcast_to(c_tot, cnt_out_ref.shape)


def cross_entropy_loss_2d(inputs, targets, *, ignore_index=255, tile_hw=None):
    """inputs: (N, C, H, W) float logits; targets: (N, H, W) int class indices."""
    N, C, H, W = inputs.shape
    hw = H * W

    # Consume NCHW directly: merging the contiguous H,W dims is a free reshape.
    x = inputs.reshape(N, C, hw)                       # native dtype, no transpose
    t = targets.reshape(N, 1, hw).astype(jnp.int32)

    # Only pad (rare) when H*W is not a multiple of the 128-lane width.
    hw_pad = _round_up(hw, 128)
    if hw_pad != hw:
        x = jnp.pad(x, ((0, 0), (0, 0), (0, hw_pad - hw)))
        t = jnp.pad(t, ((0, 0), (0, 0), (0, hw_pad - hw)),
                    constant_values=ignore_index)

    work_budget, vmem_limit, num_cores = _tpu_plan()
    itemsize = jnp.dtype(x.dtype).itemsize

    if tile_hw is None:
        # Per-lane VMEM bytes: double-buffered logits block + ~3 f32 (C,T)
        # compute temporaries + targets/accumulator rows.
        per_lane = C * (2 * itemsize + 12) + 16
        tile = (work_budget // per_lane) // 128 * 128
        tile = max(128, min(tile, 32768))
    else:
        tile = _round_up(tile_hw, 128)
    tile = min(tile, hw_pad)

    p_total = -(-hw_pad // tile)                       # number of pixel blocks
    num_cores = max(1, min(num_cores, p_total))        # don't overshard tiny images
    p_per_core = -(-p_total // num_cores)

    needs_bounds_mask = (hw % tile != 0) or (p_per_core * num_cores != p_total)

    kernel = functools.partial(
        _ce_kernel, ignore_index=ignore_index, hw=hw, tile=tile,
        p_per_core=p_per_core, needs_bounds_mask=needs_bounds_mask)

    def data_index(c, n, p):
        # Clamp phantom blocks (only exist when p_total % num_cores != 0) to a
        # valid DMA source; their contributions are masked out in the kernel.
        g = jnp.minimum(c * p_per_core + p, p_total - 1)
        return (n, 0, g)

    def out_index(c, n, p):
        return (c, 0, 0)

    cp_kwargs = dict(dimension_semantics=("parallel", "arbitrary", "arbitrary"))
    if vmem_limit is not None:
        cp_kwargs["vmem_limit_bytes"] = int(vmem_limit)

    sum_out, cnt_out = pl.pallas_call(
        kernel,
        out_shape=(
            jax.ShapeDtypeStruct((num_cores, 1, 128), jnp.float32),
            jax.ShapeDtypeStruct((num_cores, 1, 128), jnp.float32),
        ),
        grid_spec=pltpu.PrefetchScalarGridSpec(
            num_scalar_prefetch=0,
            grid=(num_cores, N, p_per_core),
            in_specs=[
                pl.BlockSpec((1, C, tile), data_index),
                pl.BlockSpec((1, 1, tile), data_index),
            ],
            out_specs=[
                pl.BlockSpec((1, 1, 128), out_index),
                pl.BlockSpec((1, 1, 128), out_index),
            ],
            scratch_shapes=[
                pltpu.VMEM((1, tile), jnp.float32),   # per-core loss-sum lanes
                pltpu.VMEM((1, tile), jnp.float32),   # per-core valid-count lanes
            ],
        ),
        compiler_params=pltpu.CompilerParams(**cp_kwargs),
    )(x, t)

    # NLLLoss(reduction='mean', weight=None): sum over valid pixels / #valid.
    # (If every pixel is ignore_index this yields NaN, matching PyTorch.)
    total = jnp.sum(sum_out[:, 0, 0])
    count = jnp.sum(cnt_out[:, 0, 0])
    return total / count


def _reference_loss(inputs, targets, ignore_index=255):
    logp = jax.nn.log_softmax(inputs.astype(jnp.float32), axis=1)  # (N,C,H,W)
    tgt = targets.astype(jnp.int32)
    valid = tgt != ignore_index
    safe_tgt = jnp.where(valid, tgt, 0)
    picked = jnp.take_along_axis(logp, safe_tgt[:, None, :, :], axis=1)[:, 0]
    loss_sum = jnp.sum(jnp.where(valid, -picked, 0.0))
    return loss_sum / jnp.sum(valid.astype(jnp.float32))


if __name__ == "__main__":
    key = jax.random.PRNGKey(0)
    k1, k2, k3 = jax.random.split(key, 3)

    N, C, H, W = 2, 4, 16, 16
    inputs = jax.random.normal(k1, (N, C, H, W), dtype=jnp.float32)
    targets = jax.random.randint(k2, (N, H, W), 0, C, dtype=jnp.int32)
    # sprinkle some ignore_index pixels to exercise the mask
    ignore_mask = jax.random.bernoulli(k3, 0.1, (N, H, W))
    targets = jnp.where(ignore_mask, 255, targets)

    loss = jax.block_until_ready(cross_entropy_loss_2d(inputs, targets))
    ref = jax.block_until_ready(_reference_loss(inputs, targets))
    assert jnp.allclose(loss, ref, atol=2e-5, rtol=2e-5), (loss, ref)

    print("KERNEL_OK")
</pallas_src>

<mosaic_0001>
module attributes {stable_mosaic.version = 11 : i64} {
  func.func @_ce_kernel(%arg0: i32, %arg1: i32, %arg2: i32, %arg3: memref<1x4x256xf32, #tpu.memory_space<vmem>>, %arg4: memref<1x1x256xi32, #tpu.memory_space<vmem>>, %arg5: memref<1x1x128xf32, #tpu.memory_space<vmem>>, %arg6: memref<1x1x128xf32, #tpu.memory_space<vmem>>, %arg7: memref<1x256xf32, #tpu.memory_space<vmem>>, %arg8: memref<1x256xf32, #tpu.memory_space<vmem>>) attributes {dimension_semantics = [#tpu.dimension_semantics<parallel>, #tpu.dimension_semantics<arbitrary>, #tpu.dimension_semantics<arbitrary>], iteration_bounds = array<i64: 1, 2, 1>, scalar_prefetch = 0 : i64, scratch_operands = 2 : i64, tpu.core_type = #tpu.core_type<tc>, window_params = [{transform_indices = @transform_0, window_bounds = array<i64: 1, 4, 256>}, {transform_indices = @transform_1, window_bounds = array<i64: 1, 1, 256>}, {transform_indices = @transform_2, window_bounds = array<i64: 1, 1, 128>}, {transform_indices = @transform_3, window_bounds = array<i64: 1, 1, 128>}]} {
    %c0_i32 = arith.constant 0 : i32
    %0 = arith.cmpi eq, %arg1, %c0_i32 : i32
    %c0_i32_0 = arith.constant 0 : i32
    %1 = arith.cmpi eq, %arg2, %c0_i32_0 : i32
    %2 = arith.andi %0, %1 : i1
    %3 = arith.extui %2 : i1 to i32
    %c0_i32_1 = arith.constant 0 : i32
    %4 = arith.cmpi ne, %3, %c0_i32_1 : i32
    scf.if %4 {
      %cst_21 = arith.constant 0.000000e+00 : f32
      %42 = vector.broadcast %cst_21 : f32 to vector<1x256xf32>
      %c0_22 = arith.constant 0 : index
      %c0_23 = arith.constant 0 : index
      %43 = vector.load %arg7[%c0_22, %c0_23] : memref<1x256xf32, #tpu.memory_space<vmem>>, vector<1x256xf32>
      tpu.vector_store %arg7[%c0_22, %c0_23], %42 {strides = array<i32>} : memref<1x256xf32, #tpu.memory_space<vmem>>, vector<1x256xf32>,
      %cst_24 = arith.constant 0.000000e+00 : f32
      %44 = vector.broadcast %cst_24 : f32 to vector<1x256xf32>
      %c0_25 = arith.constant 0 : index
      %c0_26 = arith.constant 0 : index
      %45 = vector.load %arg8[%c0_25, %c0_26] : memref<1x256xf32, #tpu.memory_space<vmem>>, vector<1x256xf32>
      tpu.vector_store %arg8[%c0_25, %c0_26], %44 {strides = array<i32>} : memref<1x256xf32, #tpu.memory_space<vmem>>, vector<1x256xf32>,
    } else {
    }
    %c0 = arith.constant 0 : index
    %c0_2 = arith.constant 0 : index
    %c0_3 = arith.constant 0 : index
    %5 = vector.load %arg3[%c0, %c0_2, %c0_3] : memref<1x4x256xf32, #tpu.memory_space<vmem>>, vector<1x4x256xf32>
    %6 = vector.shape_cast %5 : vector<1x4x256xf32> to vector<4x256xf32>
    %c0_4 = arith.constant 0 : index
    %c0_5 = arith.constant 0 : index
    %c0_6 = arith.constant 0 : index
    %7 = vector.load %arg4[%c0_4, %c0_5, %c0_6] : memref<1x1x256xi32, #tpu.memory_space<vmem>>, vector<1x1x256xi32>
    %8 = vector.shape_cast %7 : vector<1x1x256xi32> to vector<1x256xi32>
    %cst = arith.constant dense<0xFF800000> : vector<256xf32>
    %9 = vector.multi_reduction <maximumf>, %6, %cst [0] : vector<4x256xf32> to vector<256xf32>
    %10 = vector.shape_cast %9 : vector<256xf32> to vector<1x256xf32>
    %11 = vector.broadcast %10 : vector<1x256xf32> to vector<4x256xf32>
    %12 = arith.subf %6, %11 : vector<4x256xf32>
    %13 = math.exp %12 : vector<4x256xf32>
    %cst_7 = arith.constant dense<0.000000e+00> : vector<256xf32>
    %14 = vector.multi_reduction <add>, %13, %cst_7 [0] : vector<4x256xf32> to vector<256xf32>
    %15 = vector.shape_cast %14 : vector<256xf32> to vector<1x256xf32>
    %16 = tpu.iota {dimensions = array<i32: 0>} : vector<4x256xi32>
    %17 = vector.broadcast %8 : vector<1x256xi32> to vector<4x256xi32>
    %18 = arith.cmpi eq, %16, %17 : vector<4x256xi32>
    %cst_8 = arith.constant 0.000000e+00 : f32
    %19 = vector.broadcast %cst_8 : f32 to vector<4x256xf32>
    %20 = arith.select %18, %12, %19 : vector<4x256xi1>, vector<4x256xf32>
    %cst_9 = arith.constant dense<0.000000e+00> : vector<256xf32>
    %21 = vector.multi_reduction <add>, %20, %cst_9 [0] : vector<4x256xf32> to vector<256xf32>
    %22 = vector.shape_cast %21 : vector<256xf32> to vector<1x256xf32>
    %23 = math.log %15 : vector<1x256xf32>
    %24 = arith.subf %23, %22 : vector<1x256xf32>
    %c255_i32 = arith.constant 255 : i32
    %25 = vector.broadcast %c255_i32 : i32 to vector<1x256xi32>
    %26 = arith.cmpi ne, %8, %25 : vector<1x256xi32>
    %c0_10 = arith.constant 0 : index
    %c0_11 = arith.constant 0 : index
    %27 = vector.load %arg7[%c0_10, %c0_11] : memref<1x256xf32, #tpu.memory_space<vmem>>, vector<1x256xf32>
    %cst_12 = arith.constant 0.000000e+00 : f32
    %28 = vector.broadcast %cst_12 : f32 to vector<1x256xf32>
    %29 = arith.select %26, %24, %28 : vector<1x256xi1>, vector<1x256xf32>
    %30 = arith.addf %27, %29 : vector<1x256xf32>
    %c0_13 = arith.constant 0 : index
    %c0_14 = arith.constant 0 : index
    %31 = vector.load %arg7[%c0_13, %c0_14] : memref<1x256xf32, #tpu.memory_space<vmem>>, vector<1x256xf32>
    tpu.vector_store %arg7[%c0_13, %c0_14], %30 {strides = array<i32>} : memref<1x256xf32, #tpu.memory_space<vmem>>, vector<1x256xf32>,
    %c0_15 = arith.constant 0 : index
    %c0_16 = arith.constant 0 : index
    %32 = vector.load %arg8[%c0_15, %c0_16] : memref<1x256xf32, #tpu.memory_space<vmem>>, vector<1x256xf32>
    %33 = arith.extui %26 : vector<1x256xi1> to vector<1x256xi32>
    %34 = arith.sitofp %33 : vector<1x256xi32> to vector<1x256xf32>
    %35 = arith.addf %32, %34 : vector<1x256xf32>
    %c0_17 = arith.constant 0 : index
    %c0_18 = arith.constant 0 : index
    %36 = vector.load %arg8[%c0_17, %c0_18] : memref<1x256xf32, #tpu.memory_space<vmem>>, vector<1x256xf32>
    tpu.vector_store %arg8[%c0_17, %c0_18], %35 {strides = array<i32>} : memref<1x256xf32, #tpu.memory_space<vmem>>, vector<1x256xf32>,
    %c1_i32 = arith.constant 1 : i32
    %37 = arith.cmpi eq, %arg1, %c1_i32 : i32
    %c0_i32_19 = arith.constant 0 : i32
    %38 = arith.cmpi eq, %arg2, %c0_i32_19 : i32
    %39 = arith.andi %37, %38 : i1
    %40 = arith.extui %39 : i1 to i32
    %c0_i32_20 = arith.constant 0 : i32
    %41 = arith.cmpi ne, %40, %c0_i32_20 : i32
    scf.if %41 {
      %c0_21 = arith.constant 0 : index
      %c0_22 = arith.constant 0 : index
      %42 = vector.load %arg7[%c0_21, %c0_22] : memref<1x256xf32, #tpu.memory_space<vmem>>, vector<1x256xf32>
      %43 = vector.shape_cast %42 : vector<1x256xf32> to vector<1x1x256xf32>
      %cst_23 = arith.constant dense<0.000000e+00> : vector<1xf32>
      %44 = vector.multi_reduction <add>, %43, %cst_23 [1, 2] : vector<1x1x256xf32> to vector<1xf32>
      %45 = vector.shape_cast %44 : vector<1xf32> to vector<1x1x1xf32>
      %46 = vector.extract %45[0, 0, 0] : f32 from vector<1x1x1xf32>
      %c0_24 = arith.constant 0 : index
      %c0_25 = arith.constant 0 : index
      %47 = vector.load %arg8[%c0_24, %c0_25] : memref<1x256xf32, #tpu.memory_space<vmem>>, vector<1x256xf32>
      %48 = vector.shape_cast %47 : vector<1x256xf32> to vector<1x1x256xf32>
      %cst_26 = arith.constant dense<0.000000e+00> : vector<1xf32>
      %49 = vector.multi_reduction <add>, %48, %cst_26 [1, 2] : vector<1x1x256xf32> to vector<1xf32>
      %50 = vector.shape_cast %49 : vector<1xf32> to vector<1x1x1xf32>
      %51 = vector.extract %50[0, 0, 0] : f32 from vector<1x1x1xf32>
      %52 = vector.broadcast %46 : f32 to vector<1x1x128xf32>
      %c0_27 = arith.constant 0 : index
      %c0_28 = arith.constant 0 : index
      %c0_29 = arith.constant 0 : index
      %53 = vector.load %arg5[%c0_27, %c0_28, %c0_29] : memref<1x1x128xf32, #tpu.memory_space<vmem>>, vector<1x1x128xf32>
      tpu.vector_store %arg5[%c0_27, %c0_28, %c0_29], %52 {strides = array<i32>} : memref<1x1x128xf32, #tpu.memory_space<vmem>>, vector<1x1x128xf32>,
      %54 = vector.broadcast %51 : f32 to vector<1x1x128xf32>
      %c0_30 = arith.constant 0 : index
      %c0_31 = arith.constant 0 : index
      %c0_32 = arith.constant 0 : index
      %55 = vector.load %arg6[%c0_30, %c0_31, %c0_32] : memref<1x1x128xf32, #tpu.memory_space<vmem>>, vector<1x1x128xf32>
      tpu.vector_store %arg6[%c0_30, %c0_31, %c0_32], %54 {strides = array<i32>} : memref<1x1x128xf32, #tpu.memory_space<vmem>>, vector<1x1x128xf32>,
    } else {
    }
    return
  }
  func.func @transform_0(%arg0: i32, %arg1: i32, %arg2: i32) -> (i32, i32, i32) {
    %c1_i32 = arith.constant 1 : i32
    %0 = arith.muli %arg0, %c1_i32 : i32
    %1 = arith.addi %0, %arg2 : i32
    %c0_i32 = arith.constant 0 : i32
    %2 = arith.minsi %1, %c0_i32 : i32
    %c0_i32_0 = arith.constant 0 : i32
    %c0_i32_1 = arith.constant 0 : i32
    return %arg1, %c0_i32_0, %2 : i32, i32, i32
  }
  func.func @transform_1(%arg0: i32, %arg1: i32, %arg2: i32) -> (i32, i32, i32) {
    %c1_i32 = arith.constant 1 : i32
    %0 = arith.muli %arg0, %c1_i32 : i32
    %1 = arith.addi %0, %arg2 : i32
    %c0_i32 = arith.constant 0 : i32
    %2 = arith.minsi %1, %c0_i32 : i32
    %c0_i32_0 = arith.constant 0 : i32
    %c0_i32_1 = arith.constant 0 : i32
    return %arg1, %c0_i32_0, %2 : i32, i32, i32
  }
  func.func @transform_2(%arg0: i32, %arg1: i32, %arg2: i32) -> (i32, i32, i32) {
    %c0_i32 = arith.constant 0 : i32
    %c0_i32_0 = arith.constant 0 : i32
    %c0_i32_1 = arith.constant 0 : i32
    return %arg0, %c0_i32, %c0_i32_0 : i32, i32, i32
  }
  func.func @transform_3(%arg0: i32, %arg1: i32, %arg2: i32) -> (i32, i32, i32) {
    %c0_i32 = arith.constant 0 : i32
    %c0_i32_0 = arith.constant 0 : i32
    %c0_i32_1 = arith.constant 0 : i32
    return %arg0, %c0_i32, %c0_i32_0 : i32, i32, i32
  }
}

</mosaic_0001>

<bundles_post_ra>
// kernel: tpu_custom_call.1
= control target key start
LH: loop header
LB: loop body
LE: loop exit
PB: predicated region body
PF: predicated region fallthrough
CT: control target
= control target key end

     0   :  { %9 = vsyncpa [#allocation5], 0  ;;  %s1160_s0 = inlined_call_operand.hbm [shape: f32[2,4,256], index: 0, kind: input, shape index: {}]   ;;  %s1161_s1 = inlined_call_operand.hbm [shape: s32[2,1,256], index: 1, kind: input, shape index: {}]   ;;  %s1162_s2 = inlined_call_operand.hbm [shape: f32[1,1,128], index: 2, kind: output, shape index: {0}]   ;;  %s1163_s3 = inlined_call_operand.hbm [shape: f32[1,1,128], index: 3, kind: output, shape index: {1}]  }
   0x1   :  { %11 = vsyncpa [#allocation5 + $0x1], 0 }
   0x2   :  { %12 = vsyncpa [#allocation8], 0 }
   0x3   :  { %14 = vsyncpa [#allocation8 + $0x1], 0 }
   0x4   :  { %15 = vsyncpa [#allocation6], 0 }
   0x5   :  { %16 = vsyncpa [#allocation11], 0  ;;  %s902_s12 = smov 0   ;;  %s904_s13 = smov 0  }
   0x6   :  { %s906_s14 = smov 0   ;;  %s908_s15 = smov 0  }
   0x7   :  { %s910_s16 = smov 0   ;;  %s912_s17 = smov 0  }
   0x8 LB: > { %s586_s18 = sadd.s32 4294967295, %s873_s17   ;;  %s37_s19 = sadd.s32 1, %s869_s16  ;;  %s873_s17 = sphi %s912_s17, %s22_s17   ;;  %s869_s16 = sphi %s910_s16, %s1180_s16   ;;  %s865_s15 = sphi %s908_s15, %s1179_s15   ;;  %s861_s14 = sphi %s906_s14, %s1178_s14   ;;  %s857_s13 = sphi %s904_s13, %s1177_s13   ;;  %s853_s12 = sphi %s902_s12, %s1176_s12  }
   0x9   : > { %p39_p0 = scmp.ge.s32.totalorder %s37_s19, 2  ;;  %s56_s20 = sadd.s32 1, %s861_s14 }
   0xa   : > { %p63_p1 = scmp.ne.s32.totalorder %s861_s14, %s857_s13  ;;  %p64_p2 = scmp.eq.s32.totalorder %s873_s17, 0 }
   0xb   : > { %s1182_s19 = smov (%p39_p0, %s37_s19), 0  ;;  %p69_p4 = scmp.ne.s32.totalorder %s857_s13, %s853_s12 }
   0xc   : > { %p938_p3 = por %p64_p2, %p63_p1  ;;  %s51_s22 = ssub.s32 %s869_s16, %s1182_s19 }
   0xd   : > { %p70_p5 = scmp.eq.s32.totalorder %s586_s18, 0  ;;  %p54_p6 = scmp.eq.s32.totalorder %s51_s22, 0 }
   0xe   : > { %p634_p8 = scmp.lt.s32.totalorder %s873_s17, 2  ;;  %s956_s25 = sand.u32 1, %s861_s14  }
   0xf   : > { %p947_p7 = por %p70_p5, %p69_p4  ;;  %s607_s26 = sshll.u32 %s869_s16, 7 }
  0x10   : > { %s953_s24 = scalar_select %p54_p6, %s861_s14, %s56_s20  }
  0x11   : > { %s1166_s23 = scalar_select %p947_p7, 1, 0 }
  0x12   : > { %s589_s27 = sshll.u32 %s956_s25, 3  ;;  %s963_s30 = scalar_lea.hbm %s1160_s0, %s607_s26 }
  0x13   : > { %s183_s4 = scalar_lea.vmem [#allocation4], %s589_s27  ;;  %p967_p9 = pnand %p634_p8, %p938_p3 }
  0x14   : > { %s196_s5 = sshll.u32 %s183_s4, 4  ;;  %s180_s7 = scalar_lea.sflag [#allocation5], %s956_s25  ;;  %s971_s5 = int_to_ptr.vmem [resolvable:$true] %s196_s5 }
  0x15   : > { %s699_s8 = scalar_lea.hbm %s963_s30, 128  ;;  %p701_p13 = pneg %p967_p9 }
  0x16   : > { %p700_p12 = scmp.ne.s32.totalorder %s963_s30, %s699_s8  ;;  %s704_s11 = scalar_lea.hbm %s1160_s0, 256 }
  0x17   : > { %p705_p2 = scmp.lt.u32.totalorder %s963_s30, %s1160_s0  ;;  %p706_p3 = scmp.lt.u32.totalorder %s704_s11, %s699_s8 }
  0x18   : > { %p702_p0 = pnand %p701_p13, %p700_p12  ;;  %p708_p5 = scmp.lt.u32.totalorder %s699_s8, %s963_s30 }
  0x19   : > { %p707_p4 = por %p706_p3, %p705_p2 }
  0x1a   : > { %p703_p1 = pneg %p702_p0 }
  0x1b   : > { %p709_p6 = por %p708_p5, %p707_p4 }
  0x1d   : > { %p710_p8 = pnand %p709_p6, %p703_p1 }
  0x1f   : > { %713 = shalt.err (!%p710_p8)
}
  0x20   : > { %s714_s21 = scalar_lea.vmem %s971_s5, 128  ;;  %s875_s22 = smov [#allocation4]  }
  0x21   : > { %p715_p12 = scmp.ne.s32.totalorder %s971_s5, %s714_s21  ;;  %s719_s26 = sshll.u32 %s875_s22, 4  ;;  %s720_s26 = int_to_ptr.vmem [resolvable:$false] %s719_s26 }
  0x22   : > { %s721_s27 = scalar_lea.vmem %s720_s26, 256  ;;  %p722_p11 = scmp.lt.s32.totalorder %s971_s5, %s720_s26 }
  0x23   : > { %p717_p0 = pnand %p715_p12, %p701_p13  ;;  %p723_p2 = scmp.lt.s32.totalorder %s721_s27, %s714_s21 }
  0x25   : > { %p718_p10 = pneg %p717_p0  ;;  %p724_p3 = por %p723_p2, %p722_p11 }
  0x27   : > { %p725_p4 = pnand %p724_p3, %p718_p10 }
  0x29   : > { %728 = shalt.err (!%p725_p4)
}
  0x2a   : > { %630 = dma.hbm_to_vmem [thread:$0]  (!%p967_p9), %s963_s30, 128, %s971_s5, %s180_s7  }
  0x2b   : > { %p1168_p1 = scmp.lt.s32.totalorder %s873_s17, 3  ;;  %p1169_p5 = scmp.ge.s32.totalorder %s873_s17, 1 }
  0x2c   : > { %s592_s29 = sshll.u32 %s956_s25, 1  ;;  %s608_s4 = sshll.u32 %s869_s16, 5 }
  0x2d   : > { %p1005_p6 = pnand %p1169_p5, %p1168_p1  ;;  %s1014_s10 = scalar_lea.hbm %s1161_s1, %s608_s4 }
  0x2e   : > { %s207_s11 = scalar_lea.vmem [#allocation7], %s592_s29  ;;  %s204_s30 = scalar_lea.sflag [#allocation8], %s956_s25 }
  0x2f   : > { %s1170_s28 = scalar_select %p1005_p6, 1, 0 }
  0x30   : > { %s220_s12 = sshll.u32 %s207_s11, 4  ;;  %s729_s5 = scalar_lea.hbm %s1014_s10, 32  ;;  %s221_s12 = int_to_ptr.vmem [resolvable:$true] %s220_s12 }
  0x31   : > { %p730_p10 = scmp.ne.s32.totalorder %s1014_s10, %s729_s5  ;;  %s734_s21 = scalar_lea.hbm %s1161_s1, 64 }
  0x32   : > { %p735_p12 = scmp.lt.u32.totalorder %s1014_s10, %s1161_s1  ;;  %p736_p0 = scmp.lt.u32.totalorder %s734_s21, %s729_s5 }
  0x33   : > { %p732_p11 = pnand %p730_p10, %p701_p13  ;;  %p738_p3 = scmp.lt.u32.totalorder %s729_s5, %s1014_s10 }
  0x34   : > { %p737_p2 = por %p736_p0, %p735_p12 }
  0x35   : > { %p733_p8 = pneg %p732_p11 }
  0x36   : > { %p739_p4 = por %p738_p3, %p737_p2 }
  0x38   : > { %p740_p1 = pnand %p739_p4, %p733_p8 }
  0x3a   : > { %743 = shalt.err (!%p740_p1)
}
  0x3b   : > { %s744_s25 = scalar_lea.vmem %s221_s12, 32  ;;  %s876_s27 = smov [#allocation7]  }
  0x3c   : > { %p745_p5 = scmp.ne.s32.totalorder %s221_s12, %s744_s25  ;;  %s749_s29 = sshll.u32 %s876_s27, 4  ;;  %s750_s29 = int_to_ptr.vmem [resolvable:$false] %s749_s29 }
  0x3d   : > { %s751_s4 = scalar_lea.vmem %s750_s29, 64  ;;  %p752_p7 = scmp.lt.s32.totalorder %s221_s12, %s750_s29 }
  0x3e   : > { %p747_p10 = pnand %p745_p5, %p701_p13  ;;  %p753_p6 = scmp.lt.s32.totalorder %s751_s4, %s744_s25 }
  0x40   : > { %p748_p11 = pneg %p747_p10  ;;  %p754_p0 = por %p753_p6, %p752_p7 }
  0x42   : > { %p755_p12 = pnand %p754_p0, %p748_p11 }
  0x44   : > { %758 = shalt.err (!%p755_p12)
}
  0x45   : > { %633 = dma.hbm_to_vmem [thread:$0]  (!%p967_p9), %s1014_s10, 32, %s221_s12, %s204_s30  }
  0x46   : > { %p1171_p8 = scmp.ne.s32.totalorder %s1170_s28, 0 }
  0x47   : > { %s231_s8 = sand.u32 (!%p1171_p8), 1, %s857_s13   ;;  %p1172_p13 = scmp.ne.s32.totalorder (!%p1171_p8), %s1166_s23, 0 }
  0x48   : > { %229 = sbr.rel (%p1171_p8) target bundleno = 435 (0x1b3), region = 28  ;;  %s596_s9 = sshll.u32 (!%p1171_p8), %s231_s8, 3 }
  0x49   : > { %s232_s11 = scalar_lea.sflag (!%p1171_p8), [#allocation5], %s231_s8  ;;  %s235_s5 = scalar_lea.vmem (!%p1171_p8), [#allocation4], %s596_s9 }
  0x4f   : > { %836 = dma.done.wait (%p1172_p13), %s232_s11, 128  }
  0x50   : > { %838 = vsyncadd (%p1172_p13), %s232_s11, 4294967168  ;;  %s597_s7 = sshll.u32 %s231_s8, 1  ;;  %s241_s20 = scalar_lea.sflag [#allocation8], %s231_s8 }
  0x51   : > { %s244_s6 = scalar_lea.vmem [#allocation7], %s597_s7 }
  0x52   : > { %840 = dma.done.wait (%p1172_p13), %s241_s20, 32  }
  0x53   : > { %842 = vsyncadd (%p1172_p13), %s241_s20, 4294967264  ;;  %p275_p7 = scmp.eq.s32.totalorder %s865_s15, 0 }
  0x54   : > { %v281_v0 = vlaneseq (%p275_p7)  ;;  %v877_v1 = vmov (%p275_p7), 0.0  }
  0x55   : > { %280 = sbr.rel (!%p275_p7) target bundleno = 92 (0x5c), region = 40 }
  0x56   : > { %vm283_vm0 = vcmp.lt.s32.totalorder (%p275_p7), %v281_v0, 256 }
  0x57   : > { %285 = vst.msk [vmem:[#allocation2] sm:$0x3] (%p275_p7), %vm283_vm0, %v877_v1  ;;  %286 = vst.msk [vmem:[#allocation3] sm:$0x3] (%p275_p7), %vm283_vm0, %v877_v1 }
  0x5c PF: > { %v287_v2 = vld [vmem:[%s235_s5] sm:$0xff]  ;;  %vm292_vm1 = vcmask 1043456   ;;  %v1048_v3 = vld [vmem:[%s244_s6] sm:$0x3]  ;;  %p400_p9 = scmp.eq.s32.totalorder %s865_s15, 1  ;;  %v331_v10 = vlaneseq  ;;  %v878_v12 = vmov 0.0  }
  0x5d   : > { %v290_v4 = vcombine.high %v287_v2, %v287_v2  ;;  %v293_v5 = vsel %vm292_vm1, %v287_v2, -inf  ;;  %vm368_vm2 = vcmp.ne.s32.totalorder %v1048_v3, 255  ;;  %v879_v0 = vmov 1966171168  }
  0x5e   : > { %v294_v6 = vrot.slane %v293_v5, 4  ;;  %v395_v11 = vld [vmem:[#allocation3] sm:$0x3]  ;;  %v599_v13 = vsel %vm368_vm2, 1.0, %v878_v12  ;;  %vm1056_vm3 = vcmp.lt.s32.totalorder %v331_v10, 256  ;;  %v332_v25 = vshrl.u32 %v331_v10, 7 }
  0x5f   : > { %v300_v7 = vsel %vm292_vm1, %v290_v4, -inf  ;;  %v398_v17 = vadd.f32 %v599_v13, %v395_v11  ;;  %v374_v1 = vunpack.c.l.s4 %v879_v0  ;;  %vm417_vm6 = vcmask (%p400_p9), 1040384  }
  0x60   : > { %v295_v8 = vmax.f32 %v293_v5, %v294_v6  ;;  %v301_v9 = vrot.slane %v300_v7, 4  ;;  %v1062_v28 = vsub.s32 0, %v332_v25  ;;  %v1064_v30 = vsub.s32 1, %v332_v25 }
  0x61   : > { %399 = vst.msk [vmem:[#allocation3] sm:$0x3] %vm1056_vm3, %v398_v17 }
  0x62   : > { %v296_v14 = vrot.slane %v295_v8, 2  ;;  %v302_v15 = vmax.f32 %v300_v7, %v301_v9  ;;  %v336_v31 = vrot.slane %v1048_v3, %v1062_v28  ;;  %v340_v32 = vrot.slane %v1048_v3, %v1064_v30 }
  0x63   : > { %v375_v7 = vunpack.c.0.s8 %v374_v1 }
  0x64   : > { %v297_v18 = vmax.f32 %v295_v8, %v296_v14  ;;  %v303_v19 = vrot.slane %v302_v15, 2  ;;  %vm341_vm4 = vcmp.eq.s32.totalorder %v332_v25, %v336_v31  ;;  %vm342_vm5 = vcmp.eq.s32.totalorder %v332_v25, %v340_v32 }
  0x65   : > { %v378_v12 = vsub.s32 %v375_v7, %v332_v25 }
  0x66   : > { %v298_v20 = vrot.slane %v297_v18, 1  ;;  %v304_v21 = vmax.f32 %v302_v15, %v303_v19  ;;  %v369_v15 = vld [vmem:[#allocation2] sm:$0x3] }
  0x68   : > { %v299_v22 = vmax.f32 %v297_v18, %v298_v20  ;;  %v305_v23 = vrot.slane %v304_v21, 1 }
  0x6a   : > { %v306_v24 = vmax.f32 %v304_v21, %v305_v23  ;;  %v430_v21 = vld [vmem:[#allocation3] sm:$0x3] (%p400_p9) }
  0x6b   : > { %v439_v25 = vrot.slane (%p400_p9), %v430_v21, %v1064_v30 }
  0x6c   : > { %v309_v26 = vcombine.low %v299_v22, %v306_v24  ;;  %v435_v24 = vrot.slane (%p400_p9), %v430_v21, %v1062_v28 }
  0x6e   : > { %v311_v27 = vsub.f32 %v287_v2, %v309_v26 }
  0x70   : > { %v312_v29 = vmul.f32 1.442695, %v311_v27  ;;  %v344_v33 = vcombine.high %v311_v27, %v311_v27  ;;  %v346_v34 = vsel %vm341_vm4, %v311_v27, 0.0  ;;  %v442_v27 = vsel (%p400_p9), %vm417_vm6, %v435_v24, 0.0 }
  0x71   : > { %v348_v37 = vsel %vm292_vm1, %v346_v34, 0.0 }
  0x72   : > { %693 = vpow2.f32 %v312_v29  ;;  %v347_v35 = vsel %vm342_vm5, %v344_v33, 0.0  ;;  %v349_v43 = vrot.slane %v348_v37, 4  ;;  %v443_v29 = vsel (%p400_p9), %vm417_vm6, %v439_v25, 0.0 }
  0x73   : > { %v355_v41 = vsel %vm292_vm1, %v347_v35, 0.0  ;;  %v444_v31 = vadd.f32 (%p400_p9), %v443_v29, %v442_v27 }
  0x74   : > { %v356_v46 = vrot.slane %v355_v41, 4  ;;  %v350_v49 = vadd.f32 %v349_v43, %v348_v37 }
  0x76   : > { %v357_v52 = vadd.f32 %v356_v46, %v355_v41  ;;  %v351_v55 = vrot.slane %v350_v49, 2 }
  0x78   : > { %v358_v58 = vrot.slane %v357_v52, 2  ;;  %v352_v60 = vadd.f32 %v351_v55, %v350_v49 }
  0x7a   : > { %v359_v61 = vadd.f32 %v358_v58, %v357_v52  ;;  %v353_v62 = vrot.slane %v352_v60, 1 }
  0x7c   : > { %v694_v36 = vpop.eup %693  ;;  %v360_v63 = vrot.slane %v359_v61, 1  ;;  %v354_v2 = vadd.f32 %v353_v62, %v352_v60 }
  0x7d   : > { %v315_v38 = vcombine.high %v694_v36, %v694_v36  ;;  %v317_v39 = vsel %vm292_vm1, %v694_v36, 0.0 }
  0x7e   : > { %v318_v40 = vrot.slane %v317_v39, 4  ;;  %v361_v5 = vadd.f32 %v360_v63, %v359_v61 }
  0x7f   : > { %v324_v42 = vsel %vm292_vm1, %v315_v38, 0.0 }
  0x80   : > { %v319_v44 = vadd.f32 %v318_v40, %v317_v39  ;;  %v325_v45 = vrot.slane %v324_v42, 4 }
  0x82   : > { %v320_v47 = vrot.slane %v319_v44, 2  ;;  %v326_v48 = vadd.f32 %v325_v45, %v324_v42 }
  0x84   : > { %v321_v50 = vadd.f32 %v320_v47, %v319_v44  ;;  %v327_v51 = vrot.slane %v326_v48, 2 }
  0x86   : > { %v322_v53 = vrot.slane %v321_v50, 1  ;;  %v328_v54 = vadd.f32 %v327_v51, %v326_v48 }
  0x88   : > { %v323_v56 = vadd.f32 %v322_v53, %v321_v50  ;;  %v329_v57 = vrot.slane %v328_v54, 1 }
  0x8a   : > { %v330_v59 = vadd.f32 %v329_v57, %v328_v54  ;;  %695 = vlog2.f32 %v323_v56 }
  0x8c   : > { %697 = vlog2.f32 %v330_v59 }
  0x94   : > { %v696_v4 = vpop.eup %695 }
  0x95   : > { %v363_v6 = vmul.f32 0.6931472, %v696_v4 }
  0x96   : > { %v698_v8 = vpop.eup %697 }
  0x97   : > { %v365_v9 = vmul.f32 0.6931472, %v698_v8  ;;  %v366_v10 = vsub.f32 %v363_v6, %v354_v2 }
  0x99   : > { %v367_v11 = vsub.f32 %v365_v9, %v361_v5 }
  0x9b   : > { %v372_v13 = vcombine.low %v366_v10, %v367_v11 }
  0x9d   : > { %v379_v14 = vrot.slane %v372_v13, %v378_v12 }
  0x9e   : > { %404 = sbr.rel (!%p400_p9) target bundleno = 387 (0x183), region = 44 }
  0x9f   : > { %v386_v17 = vrot.slane %v379_v14, %v378_v12 }
  0xa1   : > { %v388_v18 = vsel %vm368_vm2, %v386_v17, 0.0 }
  0xa2   : > { %v389_v19 = vadd.f32 %v388_v18, %v369_v15 }
  0xa4   : > { %394 = vst.msk [vmem:[#allocation2] sm:$0x3] %vm1056_vm3, %v389_v19 }
  0xab   : > { %v405_v20 = vld [vmem:[#allocation2] sm:$0x3] }
  0xac   : > { %v410_v22 = vrot.slane %v405_v20, %v1062_v28  ;;  %v414_v23 = vrot.slane %v405_v20, %v1064_v30 }
  0xae   : > { %v418_v3 = vsel %vm417_vm6, %v410_v22, 0.0  ;;  %v419_v26 = vsel %vm417_vm6, %v414_v23, 0.0 }
  0xaf   : > { %v420_v16 = vadd.f32 %v419_v26, %v418_v3 }
  0xb1   : > { %421 = vadd.xlane.f32.xlu0 %v420_v16 }
  0xb5   : > { %445 = vadd.xlane.f32.xlu0 %v444_v31 }
 0x13e   : > { %v422_v32 = vpop.xlane.xlu0 %421 }
 0x13f   : > { %v423_v33 = vrot.slane %v422_v32, 4 }
 0x141   : > { %v424_v34 = vadd.f32 %v423_v33, %v422_v32 }
 0x142   : > { %v446_v35 = vpop.xlane.xlu0 %445 }
 0x143   : > { %v425_v36 = vrot.slane %v424_v34, 2  ;;  %v447_v37 = vrot.slane %v446_v35, 4 }
 0x145   : > { %v448_v38 = vadd.f32 %v447_v37, %v446_v35  ;;  %v426_v39 = vadd.f32 %v425_v36, %v424_v34 }
 0x147   : > { %v449_v40 = vrot.slane %v448_v38, 2  ;;  %v427_v28 = vrot.slane %v426_v39, 1 }
 0x149   : > { %v450_v41 = vadd.f32 %v449_v40, %v448_v38  ;;  %v428_v30 = vadd.f32 %v427_v28, %v426_v39 }
 0x14b   : > { %611 = vpush %v428_v30  ;;  %v451_v42 = vrot.slane %v450_v41, 1 }
 0x14d   : > { %v452_v43 = vadd.f32 %v451_v42, %v450_v41 }
 0x14f   : > { %613 = vpush %v452_v43 }
 0x17c   : > { %s612_s15 = spop %611 }
 0x17d   : > { %v454_v44 = vstv %s612_s15 }
 0x17e   : > { %455 = vst [vmem:[#allocation9] sm:$0x1] %v454_v44 }
 0x180   : > { %s614_s23 = spop %613 }
 0x181   : > { %v456_v45 = vstv %s614_s23 }
 0x182   : > { %457 = vst [vmem:[#allocation10] sm:$0x1] %v456_v45 }
 0x183 PF: > { %p1086_p6 = scmp.eq.s32.totalorder %s586_s18, 1  ;;  %s880_s10 = smov [#allocation9]  }
 0x184   : > { %s467_s12 = sshll.u32 %s880_s10, 4  ;;  %s881_s30 = smov [#allocation10]   ;;  %s468_s12 = int_to_ptr.vmem [resolvable:$true] %s467_s12 }
 0x185   : > { %s480_s21 = sshll.u32 %s881_s30, 4  ;;  %s759_s22 = scalar_lea.vmem %s468_s12, 16  ;;  %s1090_s21 = int_to_ptr.vmem [resolvable:$true] %s480_s21 }
 0x186   : > { %p760_p2 = scmp.ne.s32.totalorder %s468_s12, %s759_s22  ;;  %s765_s26 = scalar_lea.vmem %s468_s12, 32 }
 0x187   : > { %p766_p1 = scmp.lt.s32.totalorder %s468_s12, %s468_s12  ;;  %p767_p5 = scmp.lt.s32.totalorder %s765_s26, %s759_s22 }
 0x188   : > { %p761_p3 = pnand %p760_p2, %p1086_p6 }
 0x189   : > { %p768_p10 = por %p767_p5, %p766_p1 }
 0x18a   : > { %p762_p4 = pneg %p761_p3 }
 0x18c   : > { %p769_p11 = pnand %p768_p10, %p762_p4 }
 0x18e   : > { %772 = shalt.err (!%p769_p11)
}
 0x18f   : > { %s773_s27 = scalar_lea.hbm %s1162_s2, 16 }
 0x190   : > { %p774_p0 = scmp.ne.s32.totalorder %s1162_s2, %s773_s27  ;;  %p779_p13 = scmp.lt.u32.totalorder %s773_s27, %s1162_s2 }
 0x192   : > { %p775_p12 = pnand %p774_p0, %p1086_p6 }
 0x194   : > { %p776_p8 = pneg %p775_p12 }
 0x196   : > { %p781_p7 = pnand %p779_p13, %p776_p8 }
 0x198   : > { %784 = shalt.err (!%p781_p7)
}
 0x199   : > { %620 = dma.vmem_to_hbm [thread:$0]  (%p1086_p6), %s468_s12, 16, %s1162_s2, [#allocation6]  }
 0x19a   : > { %s785_s7 = scalar_lea.vmem %s1090_s21, 16  ;;  %s791_s20 = scalar_lea.vmem %s1090_s21, 32 }
 0x19b   : > { %p786_p9 = scmp.ne.s32.totalorder %s1090_s21, %s785_s7  ;;  %p792_p4 = scmp.lt.s32.totalorder %s1090_s21, %s1090_s21 }
 0x19c   : > { %p793_p1 = scmp.lt.s32.totalorder %s791_s20, %s785_s7 }
 0x19d   : > { %p787_p2 = pnand %p786_p9, %p1086_p6 }
 0x19e   : > { %p794_p5 = por %p793_p1, %p792_p4 }
 0x19f   : > { %p788_p3 = pneg %p787_p2 }
 0x1a1   : > { %p795_p10 = pnand %p794_p5, %p788_p3 }
 0x1a3   : > { %798 = shalt.err (!%p795_p10)
}
 0x1a4   : > { %s799_s23 = scalar_lea.hbm %s1163_s3, 16 }
 0x1a5   : > { %p800_p11 = scmp.ne.s32.totalorder %s1163_s3, %s799_s23  ;;  %p805_p8 = scmp.lt.u32.totalorder %s799_s23, %s1163_s3 }
 0x1a7   : > { %p801_p0 = pnand %p800_p11, %p1086_p6 }
 0x1a9   : > { %p802_p12 = pneg %p801_p0 }
 0x1ab   : > { %p807_p13 = pnand %p805_p8, %p802_p12 }
 0x1ad   : > { %810 = shalt.err (!%p807_p13)
}
 0x1ae   : > { %622 = dma.vmem_to_hbm [thread:$0]  (%p1086_p6), %s1090_s21, 16, %s1163_s3, [#allocation11]  }
 0x1af   : > { %844 = dma.done.wait (%p1086_p6), [#allocation6], 16  }
 0x1b0   : > { %846 = vsyncadd (%p1086_p6), [#allocation6], 4294967280 }
 0x1b1   : > { %848 = dma.done.wait (%p1086_p6), [#allocation11], 16  }
 0x1b2   : > { %850 = vsyncadd (%p1086_p6), [#allocation11], 4294967280 }
 0x1b3 PF: > { %s22_s17 = sadd.s32 1, %s873_s17   ;;  %s1176_s12 = smov %s857_s13 }
 0x1b4   : > { %p19_p7 = scmp.ge.s32.totalorder %s22_s17, 4   ;;  %s1177_s13 = smov %s861_s14 }
 0x1b5   : > { %s1178_s14 = smov %s953_s24  ;;  %s1179_s15 = smov %s869_s16 }
 0x1b6   : > { %s1180_s16 = smov %s1182_s19  ;;  %21 = sbr.rel (!%p19_p7) target bundleno = 8 (0x8), region = 96 }
 0x1bd   :  { %497 = vsyncpa [#allocation5], 1 }
 0x1be   :  { %499 = vsyncpa [#allocation5 + $0x1], 1 }
 0x1bf   :  { %500 = vsyncpa [#allocation8], 1 }
 0x1c0   :  { %502 = vsyncpa [#allocation8 + $0x1], 1 }
 0x1c1   :  { %503 = vsyncpa [#allocation6], 1 }
 0x1c2   :  { %505 = vsyncpa [#allocation6 + $0x1], 1 }
 0x1c3   :  { %506 = vsyncpa [#allocation11], 1 }

</bundles_post_ra>
